<compile_context>
chip_gen: v7x
topology: tpu7x:2x2x1
jax: 0.10.0
libtpu: 0.0.40
codegen_flags: <defaults>
</compile_context>

<pallas_src>
import functools

import jax
import jax.numpy as jnp
from jax.experimental import pallas as pl
from jax.experimental.pallas import tpu as pltpu


def _round_up(x, m):
    return ((x + m - 1) // m) * m


def _fused_gnn_kernel(*refs, n_layers):
    """Fused GNN forward. One kernel for the whole layer stack.

    refs layout (inputs..., outputs..., scratch...):
      refs[0]            : (Np, Np)        bf16  weighted adjacency (rows=dst, cols=src)
      refs[1]            : (Np, Fin_p)     bf16  input node features (zero padded)
      refs[2 + 2l]       : (Fi_p, Fo_p)    bf16  layer-l weight (per-layer padding)
      refs[3 + 2l]       : (1, Fo_p)       f32   layer-l bias
      refs[2 + 2L]       : (Np, Cls_p)     f32   output (padded; sliced by wrapper)
      refs[3 + 2L]       : (Np, Hid_p)     bf16  VMEM scratch carrying H between layers
    """
    adj_ref = refs[0]
    h0_ref = refs[1]
    w_refs = refs[2:2 + 2 * n_layers:2]
    b_refs = refs[3:3 + 2 * n_layers:2]
    o_ref = refs[2 + 2 * n_layers]
    h_scr = refs[3 + 2 * n_layers]

    for layer in range(n_layers):  # static unroll; layer count is small & compile-time known
        # Previous layer's H comes from the VMEM scratch (or the padded input for layer 0).
        h_in = h0_ref[...] if layer == 0 else h_scr[...]
        # Feature transform first (FLOP-minimal order): (Np, Fi) @ (Fi, Fo) on the MXU.
        xw = jnp.dot(h_in, w_refs[layer][...], preferred_element_type=jnp.float32)
        # Weighted-neighbor aggregation: (Np, Np) @ (Np, Fo) on the MXU.
        # adj is re-read from its VMEM ref per layer (cheap vld; keeps live ranges short).
        agg = jnp.dot(adj_ref[...], xw.astype(jnp.bfloat16),
                      preferred_element_type=jnp.float32)
        out = agg + b_refs[layer][...]  # f32 bias epilogue on the VPU
        if layer < n_layers - 1:
            # ReLU on all but the last layer; carry H to the next layer in bf16.
            h_scr[...] = jnp.maximum(out, 0.0).astype(jnp.bfloat16)
        else:
            o_ref[...] = out  # single lane-dense f32 store


def pack_gnn(adj, params):
    """One-time packing of the static graph + parameters (run once, outside the hot path).

    adj    : (N, N)  f32 dense weighted adjacency (adj[dst, src] = edge weight)
    params : list of (W (Fi, Fo) f32, b (1, Fo) f32) per layer
    returns (adj_padded_bf16, [(W_padded_bf16, b_padded_f32), ...])
    """
    n = adj.shape[0]
    n_pad = _round_up(max(n, 128), 128)
    # Zero padding is inert: padded source nodes have zero adjacency columns and
    # padded feature columns hit zero weight rows, so real outputs are unchanged.
    adj_p = jnp.zeros((n_pad, n_pad), jnp.float32).at[:n, :n].set(adj)
    adj_p = adj_p.astype(jnp.bfloat16)

    packed = []
    for (w, b) in params:
        fi, fo = w.shape
        fi_p = _round_up(max(fi, 128), 128)   # per-layer padding (no uniform max-dim pad)
        fo_p = _round_up(max(fo, 128), 128)
        w_p = jnp.zeros((fi_p, fo_p), jnp.float32).at[:fi, :fo].set(w).astype(jnp.bfloat16)
        b_p = jnp.zeros((1, fo_p), jnp.float32).at[:, :fo].set(b)
        packed.append((w_p, b_p))
    return adj_p, packed


def gnn_forward(adj_p, features, packed_params, n_classes):
    """Forward pass as ONE fused pallas_call (inputs pre-packed by pack_gnn).

    adj_p         : (Np, Np) bf16 padded adjacency
    features      : (N, F_in) f32 node features (padded per call; only per-call prep)
    packed_params : list of (W_padded bf16, b_padded f32)
    returns       : (N, n_classes) f32
    """
    n, f_in = features.shape
    n_pad = adj_p.shape[0]
    n_layers = len(packed_params)
    f_in_pad = packed_params[0][0].shape[0]
    hid_pad = packed_params[0][0].shape[1]
    cls_pad = packed_params[-1][0].shape[1]

    # Only per-call wrapper work: zero-pad features to the lane-dense input slab.
    h0_p = jnp.zeros((n_pad, f_in_pad), jnp.float32).at[:n, :f_in].set(features)
    h0_p = h0_p.astype(jnp.bfloat16)

    flat_params = []
    for (w_p, b_p) in packed_params:
        flat_params += [w_p, b_p]

    # Cost / VMEM accounting from the actual padded buffers (static at trace time).
    flops = 0
    bytes_accessed = adj_p.size * 2 + h0_p.size * 2 + n_pad * cls_pad * 4
    for (w_p, b_p) in packed_params:
        fi_p, fo_p = w_p.shape
        flops += 2 * n_pad * fi_p * fo_p + 2 * n_pad * n_pad * fo_p
        bytes_accessed += w_p.size * 2 + b_p.size * 4
    resident_bytes = (adj_p.size * 2 + h0_p.size * 2 + n_pad * cls_pad * 4
                      + n_pad * hid_pad * 2
                      + sum(w.size * 2 + b.size * 4 for (w, b) in packed_params))
    vmem_limit = int(min(max(2 * resident_bytes, 32 * 1024 * 1024), 128 * 1024 * 1024))

    kernel = functools.partial(_fused_gnn_kernel, n_layers=n_layers)
    vmem = pl.BlockSpec(memory_space=pltpu.MemorySpace.VMEM)  # whole array resident in VMEM
    out_p = pl.pallas_call(
        kernel,
        out_shape=jax.ShapeDtypeStruct((n_pad, cls_pad), jnp.float32),
        in_specs=[vmem] * (2 + 2 * n_layers),
        out_specs=vmem,
        scratch_shapes=[pltpu.VMEM((n_pad, hid_pad), jnp.bfloat16)],
        compiler_params=pltpu.CompilerParams(vmem_limit_bytes=vmem_limit),
        cost_estimate=pl.CostEstimate(flops=flops, transcendentals=0,
                                      bytes_accessed=bytes_accessed),
    )(adj_p, h0_p, *flat_params)

    return out_p[:n, :n_classes]


def init_gnn_params(key, in_feats, n_hidden, n_classes, n_layers):
    """Parameter init matching the module's layer structure:
       [GraphN(in, hid)] + (n_layers-1)*[GraphN(hid, hid)] + [GraphN(hid, cls)]
    """
    dims = [(in_feats, n_hidden)]
    for _ in range(n_layers - 1):
        dims.append((n_hidden, n_hidden))
    dims.append((n_hidden, n_classes))

    params = []
    for (fi, fo) in dims:
        key, kw = jax.random.split(key)
        scale = 1.0 / jnp.sqrt(jnp.float32(fi))
        w = jax.random.uniform(kw, (fi, fo), jnp.float32, -scale, scale)
        b = jnp.zeros((1, fo), jnp.float32)
        params.append((w, b))
    return params


if __name__ == "__main__":
    key = jax.random.PRNGKey(0)

    # Small, module-consistent sizes.
    num_nodes = 32
    in_feats = 16
    n_hidden = 32
    n_classes = 8
    n_layers = 2  # -> 3 GraphN layers total

    k_feat, k_adj, k_param = jax.random.split(key, 3)

    features = jax.random.normal(k_feat, (num_nodes, in_feats), jnp.float32)

    # Dense weighted adjacency standing in for (g, edge_weight):
    # sparse-ish random graph, entries are the edge weights.
    raw = jax.random.uniform(k_adj, (num_nodes, num_nodes), jnp.float32)
    mask = (jax.random.uniform(jax.random.fold_in(k_adj, 1),
                               (num_nodes, num_nodes)) < 0.25).astype(jnp.float32)
    adj = raw * mask  # adj[dst, src] = edge weight, 0 if no edge

    params = init_gnn_params(k_param, in_feats, n_hidden, n_classes, n_layers)

    # One-time packing (static graph + parameters) -- not part of the per-call path.
    adj_packed, packed_params = pack_gnn(adj, params)
    adj_packed = jax.block_until_ready(adj_packed)

    gnn_fn = jax.jit(gnn_forward, static_argnames=("n_classes",))
    out = gnn_fn(adj_packed, features, packed_params, n_classes=n_classes)
    out = jax.block_until_ready(out)
    assert out.shape == (num_nodes, n_classes)

    # Reference 1: matched precision (bf16 MXU inputs, f32 accumulation) -> tight check.
    h_ref = features
    for i, (w, b) in enumerate(params):
        xw = jnp.dot(h_ref.astype(jnp.bfloat16), w.astype(jnp.bfloat16),
                     preferred_element_type=jnp.float32)
        agg = jnp.dot(adj.astype(jnp.bfloat16), xw.astype(jnp.bfloat16),
                      preferred_element_type=jnp.float32)
        h_ref = agg + b
        if i < len(params) - 1:
            h_ref = jnp.maximum(h_ref, 0.0)
    assert jnp.allclose(out, h_ref, atol=1e-2, rtol=1e-2)

    # Reference 2: pure f32 math (module semantics) -> loose check for bf16 matmuls.
    h_f32 = features
    for i, (w, b) in enumerate(params):
        h_f32 = adj @ (h_f32 @ w) + b
        if i < len(params) - 1:
            h_f32 = jnp.maximum(h_f32, 0.0)
    assert jnp.allclose(out, h_f32, atol=0.25, rtol=0.1)

    print("KERNEL_OK")
</pallas_src>

<mosaic_0001>
module attributes {stable_mosaic.version = 11 : i64} {
  func.func @_fused_gnn_kernel(%arg0: memref<128x128xbf16, #tpu.memory_space<vmem>>, %arg1: memref<128x128xbf16, #tpu.memory_space<vmem>>, %arg2: memref<128x128xbf16, #tpu.memory_space<vmem>>, %arg3: memref<1x128xf32, #tpu.memory_space<vmem>>, %arg4: memref<128x128xbf16, #tpu.memory_space<vmem>>, %arg5: memref<1x128xf32, #tpu.memory_space<vmem>>, %arg6: memref<128x128xbf16, #tpu.memory_space<vmem>>, %arg7: memref<1x128xf32, #tpu.memory_space<vmem>>, %arg8: memref<128x128xf32, #tpu.memory_space<vmem>>, %arg9: memref<128x128xbf16, #tpu.memory_space<vmem>>) attributes {dimension_semantics = [], scalar_prefetch = 0 : i64, scratch_operands = 1 : i64, tpu.core_type = #tpu.core_type<tc>} {
    %c0 = arith.constant 0 : index
    %c0_0 = arith.constant 0 : index
    %0 = vector.load %arg1[%c0, %c0_0] : memref<128x128xbf16, #tpu.memory_space<vmem>>, vector<128x128xbf16>
    %c0_1 = arith.constant 0 : index
    %c0_2 = arith.constant 0 : index
    %1 = vector.load %arg2[%c0_1, %c0_2] : memref<128x128xbf16, #tpu.memory_space<vmem>>, vector<128x128xbf16>
    %cst = arith.constant dense<0.000000e+00> : vector<128x128xf32>
    %2 = tpu.matmul %0, %1, %cst {dimension_numbers = #tpu.dot_dimension_numbers<[1], [0], [0], [1], [0, 0, 1, 1], [], []>} : vector<128x128xbf16>, vector<128x128xbf16>, vector<128x128xf32> -> vector<128x128xf32>
    %c0_3 = arith.constant 0 : index
    %c0_4 = arith.constant 0 : index
    %3 = vector.load %arg0[%c0_3, %c0_4] : memref<128x128xbf16, #tpu.memory_space<vmem>>, vector<128x128xbf16>
    %4 = arith.truncf %2 : vector<128x128xf32> to vector<128x128xbf16>
    %cst_5 = arith.constant dense<0.000000e+00> : vector<128x128xf32>
    %5 = tpu.matmul %3, %4, %cst_5 {dimension_numbers = #tpu.dot_dimension_numbers<[1], [0], [0], [1], [0, 0, 1, 1], [], []>} : vector<128x128xbf16>, vector<128x128xbf16>, vector<128x128xf32> -> vector<128x128xf32>
    %c0_6 = arith.constant 0 : index
    %c0_7 = arith.constant 0 : index
    %6 = vector.load %arg3[%c0_6, %c0_7] : memref<1x128xf32, #tpu.memory_space<vmem>>, vector<1x128xf32>
    %7 = vector.broadcast %6 : vector<1x128xf32> to vector<128x128xf32>
    %8 = arith.addf %5, %7 : vector<128x128xf32>
    %cst_8 = arith.constant 0.000000e+00 : f32
    %9 = vector.broadcast %cst_8 : f32 to vector<128x128xf32>
    %10 = arith.maximumf %8, %9 : vector<128x128xf32>
    %11 = arith.truncf %10 : vector<128x128xf32> to vector<128x128xbf16>
    %c0_9 = arith.constant 0 : index
    %c0_10 = arith.constant 0 : index
    %12 = vector.load %arg9[%c0_9, %c0_10] : memref<128x128xbf16, #tpu.memory_space<vmem>>, vector<128x128xbf16>
    tpu.vector_store %arg9[%c0_9, %c0_10], %11 {strides = array<i32>} : memref<128x128xbf16, #tpu.memory_space<vmem>>, vector<128x128xbf16>,
    %c0_11 = arith.constant 0 : index
    %c0_12 = arith.constant 0 : index
    %13 = vector.load %arg9[%c0_11, %c0_12] : memref<128x128xbf16, #tpu.memory_space<vmem>>, vector<128x128xbf16>
    %c0_13 = arith.constant 0 : index
    %c0_14 = arith.constant 0 : index
    %14 = vector.load %arg4[%c0_13, %c0_14] : memref<128x128xbf16, #tpu.memory_space<vmem>>, vector<128x128xbf16>
    %cst_15 = arith.constant dense<0.000000e+00> : vector<128x128xf32>
    %15 = tpu.matmul %13, %14, %cst_15 {dimension_numbers = #tpu.dot_dimension_numbers<[1], [0], [0], [1], [0, 0, 1, 1], [], []>} : vector<128x128xbf16>, vector<128x128xbf16>, vector<128x128xf32> -> vector<128x128xf32>
    %c0_16 = arith.constant 0 : index
    %c0_17 = arith.constant 0 : index
    %16 = vector.load %arg0[%c0_16, %c0_17] : memref<128x128xbf16, #tpu.memory_space<vmem>>, vector<128x128xbf16>
    %17 = arith.truncf %15 : vector<128x128xf32> to vector<128x128xbf16>
    %cst_18 = arith.constant dense<0.000000e+00> : vector<128x128xf32>
    %18 = tpu.matmul %16, %17, %cst_18 {dimension_numbers = #tpu.dot_dimension_numbers<[1], [0], [0], [1], [0, 0, 1, 1], [], []>} : vector<128x128xbf16>, vector<128x128xbf16>, vector<128x128xf32> -> vector<128x128xf32>
    %c0_19 = arith.constant 0 : index
    %c0_20 = arith.constant 0 : index
    %19 = vector.load %arg5[%c0_19, %c0_20] : memref<1x128xf32, #tpu.memory_space<vmem>>, vector<1x128xf32>
    %20 = vector.broadcast %19 : vector<1x128xf32> to vector<128x128xf32>
    %21 = arith.addf %18, %20 : vector<128x128xf32>
    %cst_21 = arith.constant 0.000000e+00 : f32
    %22 = vector.broadcast %cst_21 : f32 to vector<128x128xf32>
    %23 = arith.maximumf %21, %22 : vector<128x128xf32>
    %24 = arith.truncf %23 : vector<128x128xf32> to vector<128x128xbf16>
    %c0_22 = arith.constant 0 : index
    %c0_23 = arith.constant 0 : index
    %25 = vector.load %arg9[%c0_22, %c0_23] : memref<128x128xbf16, #tpu.memory_space<vmem>>, vector<128x128xbf16>
    tpu.vector_store %arg9[%c0_22, %c0_23], %24 {strides = array<i32>} : memref<128x128xbf16, #tpu.memory_space<vmem>>, vector<128x128xbf16>,
    %c0_24 = arith.constant 0 : index
    %c0_25 = arith.constant 0 : index
    %26 = vector.load %arg9[%c0_24, %c0_25] : memref<128x128xbf16, #tpu.memory_space<vmem>>, vector<128x128xbf16>
    %c0_26 = arith.constant 0 : index
    %c0_27 = arith.constant 0 : index
    %27 = vector.load %arg6[%c0_26, %c0_27] : memref<128x128xbf16, #tpu.memory_space<vmem>>, vector<128x128xbf16>
    %cst_28 = arith.constant dense<0.000000e+00> : vector<128x128xf32>
    %28 = tpu.matmul %26, %27, %cst_28 {dimension_numbers = #tpu.dot_dimension_numbers<[1], [0], [0], [1], [0, 0, 1, 1], [], []>} : vector<128x128xbf16>, vector<128x128xbf16>, vector<128x128xf32> -> vector<128x128xf32>
    %c0_29 = arith.constant 0 : index
    %c0_30 = arith.constant 0 : index
    %29 = vector.load %arg0[%c0_29, %c0_30] : memref<128x128xbf16, #tpu.memory_space<vmem>>, vector<128x128xbf16>
    %30 = arith.truncf %28 : vector<128x128xf32> to vector<128x128xbf16>
    %cst_31 = arith.constant dense<0.000000e+00> : vector<128x128xf32>
    %31 = tpu.matmul %29, %30, %cst_31 {dimension_numbers = #tpu.dot_dimension_numbers<[1], [0], [0], [1], [0, 0, 1, 1], [], []>} : vector<128x128xbf16>, vector<128x128xbf16>, vector<128x128xf32> -> vector<128x128xf32>
    %c0_32 = arith.constant 0 : index
    %c0_33 = arith.constant 0 : index
    %32 = vector.load %arg7[%c0_32, %c0_33] : memref<1x128xf32, #tpu.memory_space<vmem>>, vector<1x128xf32>
    %33 = vector.broadcast %32 : vector<1x128xf32> to vector<128x128xf32>
    %34 = arith.addf %31, %33 : vector<128x128xf32>
    %c0_34 = arith.constant 0 : index
    %c0_35 = arith.constant 0 : index
    %35 = vector.load %arg8[%c0_34, %c0_35] : memref<128x128xf32, #tpu.memory_space<vmem>>, vector<128x128xf32>
    tpu.vector_store %arg8[%c0_34, %c0_35], %34 {strides = array<i32>} : memref<128x128xf32, #tpu.memory_space<vmem>>, vector<128x128xf32>,
    return
  }
}

</mosaic_0001>

<bundles_post_ra>
// kernel: gnn_forward.1
= control target key start
LH: loop header
LB: loop body
LE: loop exit
PB: predicated region body
PF: predicated region fallthrough
CT: control target
= control target key end

     0   :  { %13 = vsyncpa [#allocation4], 0  ;;  %s1940_s0 = inlined_call_operand.vmem [shape: bf16[128,128], index: 0, kind: input, shape index: {}]   ;;  %s1941_s1 = inlined_call_operand.vmem [shape: bf16[128,128], index: 1, kind: input, shape index: {}]   ;;  %s1942_s2 = inlined_call_operand.vmem [shape: bf16[128,128], index: 2, kind: input, shape index: {}]   ;;  %s1943_s3 = inlined_call_operand.vmem [shape: f32[1,128], index: 3, kind: input, shape index: {}]   ;;  %s1944_s4 = inlined_call_operand.hbm [shape: bf16[128,128], index: 4, kind: input, shape index: {}]   ;;  %s1945_s5 = inlined_call_operand.vmem [shape: f32[1,128], index: 5, kind: input, shape index: {}]   ;;  %s1946_s6 = inlined_call_operand.hbm [shape: bf16[128,128], index: 6, kind: input, shape index: {}]   ;;  %s1947_s7 = inlined_call_operand.vmem [shape: f32[1,128], index: 7, kind: input, shape index: {}]   ;;  %s1948_s8 = inlined_call_operand.vmem [shape: f32[128,128], index: 8, kind: output, shape index: {}]  }
   0x1   :  { %14 = vsyncpa [#allocation6], 0  ;;  %s1690_s27 = smov [#allocation3]   ;;  %s1642_s9 = scalar_lea.hbm %s1944_s4, 1024 }
   0x2   :  { %s28_s28 = sshll.u32 %s1690_s27, 4  ;;  %p1643_p0 = scmp.ne.s32.totalorder %s1944_s4, %s1642_s9  ;;  %s29_s28 = int_to_ptr.vmem [resolvable:$true] %s28_s28 }
   0x3   :  { %p1646_p1 = scmp.lt.u32.totalorder %s1642_s9, %s1944_s4 }
   0x5   :  { %p1648_p2 = pnand %p1646_p1, %p1643_p0 }
   0x7   :  { %1651 = shalt.err (!%p1648_p2)
}
   0x8   :  { %s1652_s14 = scalar_lea.vmem %s29_s28, 1024  ;;  %p1657_p4 = scmp.lt.s32.totalorder %s29_s28, %s29_s28 }
   0x9   :  { %p1653_p3 = scmp.ne.s32.totalorder %s29_s28, %s1652_s14  ;;  %p1658_p5 = scmp.lt.s32.totalorder %s1652_s14, %s1652_s14 }
   0xb   :  { %p1659_p6 = por %p1658_p5, %p1657_p4 }
   0xd   :  { %p1660_p7 = pnand %p1659_p6, %p1653_p3 }
   0xf   :  { %1663 = shalt.err (!%p1660_p7)
}
  0x10   :  { %s1691_s15 = smov 64   ;;  %s1692_s16 = smov 4  }
  0x11   :  { %34 = dma.hbm_to_vmem [thread:$0]  %s1944_s4, 1024, %s29_s28, [#allocation4], %s1691_s15, %s1691_s15, %s1692_s16  }
  0x12   :  { %s1693_s19 = smov [#allocation5]   ;;  %s1664_s23 = scalar_lea.hbm %s1946_s6, 1024 }
  0x13   :  { %s42_s20 = sshll.u32 %s1693_s19, 4  ;;  %p1665_p8 = scmp.ne.s32.totalorder %s1946_s6, %s1664_s23  ;;  %s43_s20 = int_to_ptr.vmem [resolvable:$true] %s42_s20 }
  0x14   :  { %p1668_p9 = scmp.lt.u32.totalorder %s1664_s23, %s1946_s6 }
  0x16   :  { %p1670_p10 = pnand %p1668_p9, %p1665_p8 }
  0x18   :  { %1673 = shalt.err (!%p1670_p10)
}
  0x19   :  { %s1674_s29 = scalar_lea.vmem %s43_s20, 1024  ;;  %p1679_p12 = scmp.lt.s32.totalorder %s43_s20, %s43_s20 }
  0x1a   :  { %p1675_p11 = scmp.ne.s32.totalorder %s43_s20, %s1674_s29  ;;  %p1680_p13 = scmp.lt.s32.totalorder %s1674_s29, %s1674_s29 }
  0x1c   :  { %p1681_p0 = por %p1680_p13, %p1679_p12 }
  0x1e   :  { %p1682_p1 = pnand %p1681_p0, %p1675_p11 }
  0x20   :  { %1685 = shalt.err (!%p1682_p1)
}
  0x21   :  { %48 = dma.hbm_to_vmem [thread:$0]  %s1946_s6, 1024, %s43_s20, [#allocation6], %s1691_s15, %s1691_s15, %s1692_s16  }
  0x22   :  { %1686 = dma.done.wait [#allocation4], 1024  }
  0x23   :  { %1687 = vsyncadd [#allocation4], 4294966272 }
  0x24   :  { %1688 = dma.done.wait [#allocation6], 1024  }
  0x25   :  { %1689 = vsyncadd [#allocation6], 4294966272  ;;  %v1586_v0 = vld [vmem:[%s1942_s2] sm:$0xff]   ;;  %v1587_v1 = vld [vmem:[%s1942_s2 + $0x8] sm:$0xff]  }
  0x26   :  { %1390 = vmatprep.subr.bf16.mxu0 %v1586_v0  ;;  %v1588_v2 = vld [vmem:[%s1942_s2 + $0x10] sm:$0xff]   ;;  %v1589_v3 = vld [vmem:[%s1942_s2 + $0x18] sm:$0xff]   ;;  %v1594_v4 = vld [vmem:[%s1941_s1] sm:$0xff]  }
  0x27   :  { %1391 = vmatpush3.bf16.msra.mxu0 %v1586_v0  ;;  %1406 = vmatprep.mubr.bf16.mxu0 %v1594_v4  ;;  %v1590_v5 = vld [vmem:[%s1942_s2 + $0x20] sm:$0xff]   ;;  %v1591_v6 = vld [vmem:[%s1942_s2 + $0x28] sm:$0xff]   ;;  %v1592_v7 = vld [vmem:[%s1942_s2 + $0x30] sm:$0xff]  }
  0x28   :  { %1392 = vmatprep.subr.bf16.mxu0 %v1587_v1  ;;  %v1593_v8 = vld [vmem:[%s1942_s2 + $0x38] sm:$0xff]   ;;  %v1595_v9 = vld [vmem:[%s1941_s1 + $0x8] sm:$0xff]   ;;  %v1596_v10 = vld [vmem:[%s1941_s1 + $0x10] sm:$0xff]  }
  0x29   :  { %v1597_v11 = vld [vmem:[%s1941_s1 + $0x18] sm:$0xff]   ;;  %v1598_v12 = vld [vmem:[%s1941_s1 + $0x20] sm:$0xff]   ;;  %v1599_v13 = vld [vmem:[%s1941_s1 + $0x28] sm:$0xff]  }
  0x2a   :  { %v1600_v14 = vld [vmem:[%s1941_s1 + $0x30] sm:$0xff]   ;;  %v1601_v15 = vld [vmem:[%s1941_s1 + $0x38] sm:$0xff]   ;;  %v1602_v16 = vld [vmem:[%s1940_s0] sm:$0xff]  }
  0x2b   :  { %1393 = vmatpush3.bf16.msra.mxu0 %v1587_v1  ;;  %1438 = vmatprep.mubr.bf16.mxu1 %v1602_v16  ;;  %v1610_v17 = vld [vmem:[#allocation3] sm:$0xff]   ;;  %v1611_v18 = vld [vmem:[#allocation3 + $0x8] sm:$0xff]   ;;  %v1612_v19 = vld [vmem:[#allocation3 + $0x10] sm:$0xff]  }
  0x2c   :  { %1394 = vmatprep.subr.bf16.mxu0 %v1588_v2  ;;  %v1613_v20 = vld [vmem:[#allocation3 + $0x18] sm:$0xff]   ;;  %v1614_v21 = vld [vmem:[#allocation3 + $0x20] sm:$0xff]   ;;  %v1615_v22 = vld [vmem:[#allocation3 + $0x28] sm:$0xff]  }
  0x2d   :  { %v1603_v47 = vld [vmem:[%s1940_s0 + $0x8] sm:$0xff]   ;;  %v1604_v48 = vld [vmem:[%s1940_s0 + $0x10] sm:$0xff]   ;;  %v1605_v49 = vld [vmem:[%s1940_s0 + $0x18] sm:$0xff]  }
  0x2e   :  { %v1606_v50 = vld [vmem:[%s1940_s0 + $0x20] sm:$0xff]   ;;  %v1607_v51 = vld [vmem:[%s1940_s0 + $0x28] sm:$0xff]   ;;  %v1608_v52 = vld [vmem:[%s1940_s0 + $0x30] sm:$0xff]  }
  0x2f   :  { %1395 = vmatpush3.bf16.msra.mxu0 %v1588_v2  ;;  %v1609_v53 = vld [vmem:[%s1940_s0 + $0x38] sm:$0xff]   ;;  %v1616_v54 = vld [vmem:[#allocation3 + $0x30] sm:$0xff]   ;;  %v1251_v56 = vld [vmem:[%s1943_s3] ss:$0 sm:$0xff] }
  0x30   :  { %1396 = vmatprep.subr.bf16.mxu0 %v1589_v3  ;;  %v1617_v55 = vld [vmem:[#allocation3 + $0x38] sm:$0xff]  }
  0x33   :  { %1397 = vmatpush3.bf16.msra.mxu0 %v1589_v3 }
  0x34   :  { %1398 = vmatprep.subr.bf16.mxu0 %v1590_v5 }
  0x37   :  { %1399 = vmatpush3.bf16.msra.mxu0 %v1590_v5 }
  0x38   :  { %1400 = vmatprep.subr.bf16.mxu0 %v1591_v6 }
  0x3b   :  { %1401 = vmatpush3.bf16.msra.mxu0 %v1591_v6 }
  0x3c   :  { %1402 = vmatprep.subr.bf16.mxu0 %v1592_v7 }
  0x3f   :  { %1403 = vmatpush3.bf16.msra.mxu0 %v1592_v7 }
  0x40   :  { %1404 = vmatprep.subr.bf16.mxu0 %v1593_v8 }
  0x43   :  { %1405 = vmatpush3.bf16.msra.mxu0 %v1593_v8 }
  0x44   :  { %1454 = vmatprep.subr.bf16.mxu0 %v1610_v17 }
  0x46   :  { %1407 = vmatmul.mubr.bf16.vlgmr.msra.gmra.mrb[0].mxu0 %v1595_v9 }
  0x47   :  { %1410 = vmatprep.mubr.bf16.mxu0 %v1596_v10  ;;  %1455 = vmatpush3.bf16.msra.mxu0 %v1610_v17 }
  0x48   :  { %1456 = vmatprep.subr.bf16.mxu0 %v1611_v18 }
  0x4b   :  { %1457 = vmatpush3.bf16.msra.mxu0 %v1611_v18 }
  0x4c   :  { %1458 = vmatprep.subr.bf16.mxu0 %v1612_v19 }
  0x4e   :  { %1411 = vmatmul.mubr.bf16.gmra.mrb[4].mxu0 %v1597_v11 }
  0x4f   :  { %1414 = vmatprep.mubr.bf16.mxu0 %v1598_v12  ;;  %1459 = vmatpush3.bf16.msra.mxu0 %v1612_v19 }
  0x50   :  { %1460 = vmatprep.subr.bf16.mxu0 %v1613_v20 }
  0x53   :  { %1461 = vmatpush3.bf16.msra.mxu0 %v1613_v20 }
  0x54   :  { %1462 = vmatprep.subr.bf16.mxu0 %v1614_v21 }
  0x56   :  { %1415 = vmatmul.mubr.bf16.gmra.mrb[8].mxu0 %v1599_v13 }
  0x57   :  { %1418 = vmatprep.mubr.bf16.mxu0 %v1600_v14  ;;  %1463 = vmatpush3.bf16.msra.mxu0 %v1614_v21 }
  0x58   :  { %1464 = vmatprep.subr.bf16.mxu0 %v1615_v22 }
  0x5b   :  { %1465 = vmatpush3.bf16.msra.mxu0 %v1615_v22 }
  0x5c   :  { %1466 = vmatprep.subr.bf16.mxu0 %v1616_v54 }
  0x5e   :  { %1419 = vmatmul.mubr.bf16.gmra.mrb[12].mxu0 %v1601_v15 }
  0x5f   :  { %1467 = vmatpush3.bf16.msra.mxu0 %v1616_v54  ;;  %v1630_v54 = vld [vmem:[#allocation5 + $0x20] sm:$0xff]  }
  0x60   :  { %1468 = vmatprep.subr.bf16.mxu0 %v1617_v55 }
  0x63   :  { %1469 = vmatpush3.bf16.msra.mxu0 %v1617_v55  ;;  %v1631_v55 = vld [vmem:[#allocation5 + $0x28] sm:$0xff]  }
 0x119   :  { %v1408_v23 = vpop.f32.mrb[0].mxu0 }
 0x11a   :  { %v220_v24 = vpop.f32.mrb[1].mxu0 }
 0x11b   :  { %v1409_v25 = vpop.f32.mrb[2].mxu0 }
 0x11c   :  { %v300_v26 = vpack.c.bf16 %v1409_v25, %v1408_v23  ;;  %v223_v27 = vpop.f32.mrb[3].mxu0 }
 0x11d   :  { %v299_v28 = vpack.c.bf16 %v223_v27, %v220_v24 }
 0x11f   :  { %1422 = vmatprep.subr.bf16.mxu1 %v299_v28 }
 0x120   :  { %1423 = vmatpush3.bf16.msra.mxu1 %v299_v28 }
 0x121   :  { %v1412_v29 = vpop.f32.mrb[4].mxu0  ;;  %1424 = vmatprep.subr.bf16.mxu1 %v300_v26 }
 0x122   :  { %v236_v30 = vpop.f32.mrb[5].mxu0 }
 0x123   :  { %v1413_v31 = vpop.f32.mrb[6].mxu0 }
 0x124   :  { %v302_v32 = vpack.c.bf16 %v1413_v31, %v1412_v29  ;;  %v239_v33 = vpop.f32.mrb[7].mxu0  ;;  %1425 = vmatpush3.bf16.msra.mxu1 %v300_v26 }
 0x125   :  { %v301_v34 = vpack.c.bf16 %v239_v33, %v236_v30 }
 0x127   :  { %1426 = vmatprep.subr.bf16.mxu1 %v301_v34 }
 0x128   :  { %1427 = vmatpush3.bf16.msra.mxu1 %v301_v34 }
 0x129   :  { %v1416_v35 = vpop.f32.mrb[8].mxu0  ;;  %1428 = vmatprep.subr.bf16.mxu1 %v302_v32 }
 0x12a   :  { %v252_v36 = vpop.f32.mrb[9].mxu0 }
 0x12b   :  { %v1417_v37 = vpop.f32.mrb[10].mxu0 }
 0x12c   :  { %v304_v38 = vpack.c.bf16 %v1417_v37, %v1416_v35  ;;  %v255_v39 = vpop.f32.mrb[11].mxu0  ;;  %1429 = vmatpush3.bf16.msra.mxu1 %v302_v32 }
 0x12d   :  { %v303_v40 = vpack.c.bf16 %v255_v39, %v252_v36 }
 0x12f   :  { %1430 = vmatprep.subr.bf16.mxu1 %v303_v40 }
 0x130   :  { %1431 = vmatpush3.bf16.msra.mxu1 %v303_v40 }
 0x131   :  { %v1420_v41 = vpop.f32.mrb[12].mxu0  ;;  %1432 = vmatprep.subr.bf16.mxu1 %v304_v38 }
 0x132   :  { %v268_v42 = vpop.f32.mrb[13].mxu0 }
 0x133   :  { %v1421_v43 = vpop.f32.mrb[14].mxu0 }
 0x134   :  { %v306_v44 = vpack.c.bf16 %v1421_v43, %v1420_v41  ;;  %v271_v45 = vpop.f32.mrb[15].mxu0  ;;  %1433 = vmatpush3.bf16.msra.mxu1 %v304_v38 }
 0x135   :  { %v305_v46 = vpack.c.bf16 %v271_v45, %v268_v42 }
 0x137   :  { %1434 = vmatprep.subr.bf16.mxu1 %v305_v46 }
 0x138   :  { %1435 = vmatpush3.bf16.msra.mxu1 %v305_v46 }
 0x139   :  { %1436 = vmatprep.subr.bf16.mxu1 %v306_v44 }
 0x13c   :  { %1437 = vmatpush3.bf16.msra.mxu1 %v306_v44 }
 0x13f   :  { %1439 = vmatmul.mubr.bf16.vlgmr.msra.gmra.mrb[0].mxu1 %v1603_v47 }
 0x140   :  { %1442 = vmatprep.mubr.bf16.mxu1 %v1604_v48 }
 0x147   :  { %1443 = vmatmul.mubr.bf16.gmra.mrb[4].mxu1 %v1605_v49  ;;  %v1618_v49 = vld [vmem:[%s1940_s0] sm:$0xff]  }
 0x148   :  { %1446 = vmatprep.mubr.bf16.mxu1 %v1606_v50  ;;  %v1626_v50 = vld [vmem:[#allocation5] sm:$0xff]  }
 0x149   :  { %1518 = vmatprep.subr.bf16.mxu0 %v1626_v50 }
 0x14f   :  { %1447 = vmatmul.mubr.bf16.gmra.mrb[8].mxu1 %v1607_v51  ;;  %v1627_v51 = vld [vmem:[#allocation5 + $0x8] sm:$0xff]  }
 0x150   :  { %1450 = vmatprep.mubr.bf16.mxu1 %v1608_v52  ;;  %v1628_v52 = vld [vmem:[#allocation5 + $0x10] sm:$0xff]  }
 0x157   :  { %1451 = vmatmul.mubr.bf16.gmra.mrb[12].mxu1 %v1609_v53  ;;  %v1629_v53 = vld [vmem:[#allocation5 + $0x18] sm:$0xff]  }
 0x158   :  { %1502 = vmatprep.mubr.bf16.mxu1 %v1618_v49 }
 0x212   :  { %v1440_v57 = vpop.f32.mrb[0].mxu1 }
 0x213   :  { %v405_v58 = vadd.f32 %v1440_v57, %v1251_v56  ;;  %v396_v59 = vpop.f32.mrb[1].mxu1 }
 0x214   :  { %v397_v60 = vadd.f32 %v1251_v56, %v396_v59  ;;  %v1441_v61 = vpop.f32.mrb[2].mxu1 }
 0x215   :  { %v408_v62 = vadd.f32 %v1441_v61, %v1251_v56  ;;  %v399_v63 = vpop.f32.mrb[3].mxu1  ;;  %v461_v1 = vmax.f32 %v405_v58, 0.0 }
 0x216   :  { %v400_v0 = vadd.f32 %v1251_v56, %v399_v63  ;;  %v459_v3 = vmax.f32 %v397_v60, 0.0 }
 0x217   :  { %v462_v2 = vmax.f32 %v408_v62, 0.0 }
 0x218   :  { %v460_v4 = vmax.f32 %v400_v0, 0.0 }
 0x219   :  { %v476_v5 = vpack.c.bf16 %v462_v2, %v461_v1 }
 0x21a   :  { %v475_v6 = vpack.c.bf16 %v460_v4, %v459_v3  ;;  %v1444_v7 = vpop.f32.mrb[4].mxu1 }
 0x21b   :  { %v421_v8 = vadd.f32 %v1444_v7, %v1251_v56  ;;  %v412_v9 = vpop.f32.mrb[5].mxu1 }
 0x21c   :  { %v413_v10 = vadd.f32 %v1251_v56, %v412_v9  ;;  %v1445_v11 = vpop.f32.mrb[6].mxu1  ;;  %1470 = vmatprep.mubr.bf16.mxu0 %v475_v6 }
 0x21d   :  { %v424_v12 = vadd.f32 %v1445_v11, %v1251_v56  ;;  %v415_v13 = vpop.f32.mrb[7].mxu1  ;;  %1471 = vmatmul.mubr.bf16.vlgmr.msra.gmra.mrb[16].mxu0 %v476_v5  ;;  %v465_v15 = vmax.f32 %v421_v8, 0.0 }
 0x21e   :  { %v416_v14 = vadd.f32 %v1251_v56, %v415_v13  ;;  %v463_v17 = vmax.f32 %v413_v10, 0.0  ;;  %1519 = vmatpush3.bf16.msra.mxu0 %v1626_v50 }
 0x21f   :  { %v466_v16 = vmax.f32 %v424_v12, 0.0  ;;  %1520 = vmatprep.subr.bf16.mxu0 %v1627_v51 }
 0x220   :  { %v464_v18 = vmax.f32 %v416_v14, 0.0 }
 0x221   :  { %v478_v19 = vpack.c.bf16 %v466_v16, %v465_v15  ;;  %v1619_v16 = vld [vmem:[%s1940_s0 + $0x8] sm:$0xff]  }
 0x222   :  { %v477_v20 = vpack.c.bf16 %v464_v18, %v463_v17  ;;  %v1448_v21 = vpop.f32.mrb[8].mxu1  ;;  %1521 = vmatpush3.bf16.msra.mxu0 %v1627_v51  ;;  %v1620_v17 = vld [vmem:[%s1940_s0 + $0x10] sm:$0xff]   ;;  %v1621_v18 = vld [vmem:[%s1940_s0 + $0x18] sm:$0xff]  }
 0x223   :  { %v437_v22 = vadd.f32 %v1448_v21, %v1251_v56  ;;  %v428_v23 = vpop.f32.mrb[9].mxu1  ;;  %1522 = vmatprep.subr.bf16.mxu0 %v1628_v52  ;;  %v1624_v21 = vld [vmem:[%s1940_s0 + $0x30] sm:$0xff]  }
 0x224   :  { %v429_v24 = vadd.f32 %v1251_v56, %v428_v23  ;;  %v1449_v25 = vpop.f32.mrb[10].mxu1  ;;  %1474 = vmatprep.mubr.bf16.mxu0 %v477_v20  ;;  %v1623_v20 = vld [vmem:[%s1940_s0 + $0x28] sm:$0xff]   ;;  %v1632_v23 = vld [vmem:[#allocation5 + $0x30] sm:$0xff]  }
 0x225   :  { %v440_v26 = vadd.f32 %v1449_v25, %v1251_v56  ;;  %v431_v27 = vpop.f32.mrb[11].mxu1  ;;  %1475 = vmatmul.mubr.bf16.gmra.mrb[20].mxu0 %v478_v19  ;;  %v469_v29 = vmax.f32 %v437_v22, 0.0  ;;  %v1622_v19 = vld [vmem:[%s1940_s0 + $0x20] sm:$0xff]   ;;  %v1625_v22 = vld [vmem:[%s1940_s0 + $0x38] sm:$0xff]  }
 0x226   :  { %v432_v28 = vadd.f32 %v1251_v56, %v431_v27  ;;  %v467_v31 = vmax.f32 %v429_v24, 0.0  ;;  %1523 = vmatpush3.bf16.msra.mxu0 %v1628_v52  ;;  %v1633_v24 = vld [vmem:[#allocation5 + $0x38] sm:$0xff]   ;;  %v1268_v25 = vld [vmem:[%s1945_s5] ss:$0 sm:$0xff] }
 0x227   :  { %v470_v30 = vmax.f32 %v440_v26, 0.0  ;;  %1524 = vmatprep.subr.bf16.mxu0 %v1629_v53 }
 0x228   :  { %v468_v32 = vmax.f32 %v432_v28, 0.0 }
 0x229   :  { %v480_v33 = vpack.c.bf16 %v470_v30, %v469_v29 }
 0x22a   :  { %v479_v34 = vpack.c.bf16 %v468_v32, %v467_v31  ;;  %v1452_v35 = vpop.f32.mrb[12].mxu1  ;;  %1525 = vmatpush3.bf16.msra.mxu0 %v1629_v53 }
 0x22b   :  { %v453_v36 = vadd.f32 %v1452_v35, %v1251_v56  ;;  %v444_v37 = vpop.f32.mrb[13].mxu1  ;;  %1526 = vmatprep.subr.bf16.mxu0 %v1630_v54 }
 0x22c   :  { %v445_v38 = vadd.f32 %v1251_v56, %v444_v37  ;;  %v1453_v39 = vpop.f32.mrb[14].mxu1  ;;  %1478 = vmatprep.mubr.bf16.mxu0 %v479_v34 }
 0x22d   :  { %v456_v40 = vadd.f32 %v1453_v39, %v1251_v56  ;;  %v447_v41 = vpop.f32.mrb[15].mxu1  ;;  %1479 = vmatmul.mubr.bf16.gmra.mrb[24].mxu0 %v480_v33  ;;  %v473_v43 = vmax.f32 %v453_v36, 0.0 }
 0x22e   :  { %v448_v42 = vadd.f32 %v1251_v56, %v447_v41  ;;  %v471_v45 = vmax.f32 %v445_v38, 0.0  ;;  %1527 = vmatpush3.bf16.msra.mxu0 %v1630_v54 }
 0x22f   :  { %v474_v44 = vmax.f32 %v456_v40, 0.0  ;;  %1528 = vmatprep.subr.bf16.mxu0 %v1631_v55 }
 0x230   :  { %v472_v46 = vmax.f32 %v448_v42, 0.0 }
 0x231   :  { %v482_v47 = vpack.c.bf16 %v474_v44, %v473_v43 }
 0x232   :  { %v481_v48 = vpack.c.bf16 %v472_v46, %v471_v45  ;;  %1529 = vmatpush3.bf16.msra.mxu0 %v1631_v55 }
 0x233   :  { %1530 = vmatprep.subr.bf16.mxu0 %v1632_v23 }
 0x234   :  { %1482 = vmatprep.mubr.bf16.mxu0 %v481_v48 }
 0x235   :  { %1483 = vmatmul.mubr.bf16.gmra.mrb[28].mxu0 %v482_v47 }
 0x236   :  { %1531 = vmatpush3.bf16.msra.mxu0 %v1632_v23 }
 0x237   :  { %1532 = vmatprep.subr.bf16.mxu0 %v1633_v24 }
 0x23a   :  { %1533 = vmatpush3.bf16.msra.mxu0 %v1633_v24 }
 0x2f0   :  { %v1472_v56 = vpop.f32.mrb[16].mxu0 }
 0x2f1   :  { %v597_v57 = vpop.f32.mrb[17].mxu0 }
 0x2f2   :  { %v1473_v58 = vpop.f32.mrb[18].mxu0 }
 0x2f3   :  { %v677_v59 = vpack.c.bf16 %v1473_v58, %v1472_v56  ;;  %v600_v60 = vpop.f32.mrb[19].mxu0 }
 0x2f4   :  { %v676_v61 = vpack.c.bf16 %v600_v60, %v597_v57 }
 0x2f6   :  { %1486 = vmatprep.subr.bf16.mxu1 %v676_v61 }
 0x2f7   :  { %1487 = vmatpush3.bf16.msra.mxu1 %v676_v61 }
 0x2f8   :  { %v1476_v62 = vpop.f32.mrb[20].mxu0  ;;  %1488 = vmatprep.subr.bf16.mxu1 %v677_v59 }
 0x2f9   :  { %v613_v63 = vpop.f32.mrb[21].mxu0 }
 0x2fa   :  { %v1477_v0 = vpop.f32.mrb[22].mxu0 }
 0x2fb   :  { %v679_v1 = vpack.c.bf16 %v1477_v0, %v1476_v62  ;;  %v616_v2 = vpop.f32.mrb[23].mxu0  ;;  %1489 = vmatpush3.bf16.msra.mxu1 %v677_v59 }
 0x2fc   :  { %v678_v3 = vpack.c.bf16 %v616_v2, %v613_v63 }
 0x2fe   :  { %1490 = vmatprep.subr.bf16.mxu1 %v678_v3 }
 0x2ff   :  { %1491 = vmatpush3.bf16.msra.mxu1 %v678_v3 }
 0x300   :  { %v1480_v4 = vpop.f32.mrb[24].mxu0  ;;  %1492 = vmatprep.subr.bf16.mxu1 %v679_v1 }
 0x301   :  { %v629_v5 = vpop.f32.mrb[25].mxu0 }
 0x302   :  { %v1481_v6 = vpop.f32.mrb[26].mxu0 }
 0x303   :  { %v681_v7 = vpack.c.bf16 %v1481_v6, %v1480_v4  ;;  %v632_v8 = vpop.f32.mrb[27].mxu0  ;;  %1493 = vmatpush3.bf16.msra.mxu1 %v679_v1 }
 0x304   :  { %v680_v9 = vpack.c.bf16 %v632_v8, %v629_v5 }
 0x306   :  { %1494 = vmatprep.subr.bf16.mxu1 %v680_v9 }
 0x307   :  { %1495 = vmatpush3.bf16.msra.mxu1 %v680_v9 }
 0x308   :  { %v1484_v10 = vpop.f32.mrb[28].mxu0  ;;  %1496 = vmatprep.subr.bf16.mxu1 %v681_v7 }
 0x309   :  { %v645_v11 = vpop.f32.mrb[29].mxu0 }
 0x30a   :  { %v1485_v12 = vpop.f32.mrb[30].mxu0 }
 0x30b   :  { %v683_v13 = vpack.c.bf16 %v1485_v12, %v1484_v10  ;;  %v648_v14 = vpop.f32.mrb[31].mxu0  ;;  %1497 = vmatpush3.bf16.msra.mxu1 %v681_v7 }
 0x30c   :  { %v682_v15 = vpack.c.bf16 %v648_v14, %v645_v11 }
 0x30e   :  { %1498 = vmatprep.subr.bf16.mxu1 %v682_v15 }
 0x30f   :  { %1499 = vmatpush3.bf16.msra.mxu1 %v682_v15 }
 0x310   :  { %1500 = vmatprep.subr.bf16.mxu1 %v683_v13 }
 0x313   :  { %1501 = vmatpush3.bf16.msra.mxu1 %v683_v13 }
 0x316   :  { %1503 = vmatmul.mubr.bf16.vlgmr.msra.gmra.mrb[16].mxu1 %v1619_v16 }
 0x317   :  { %1506 = vmatprep.mubr.bf16.mxu1 %v1620_v17 }
 0x31e   :  { %1507 = vmatmul.mubr.bf16.gmra.mrb[20].mxu1 %v1621_v18  ;;  %v1634_v18 = vld [vmem:[%s1940_s0] sm:$0xff]  }
 0x31f   :  { %1510 = vmatprep.mubr.bf16.mxu1 %v1622_v19 }
 0x326   :  { %1511 = vmatmul.mubr.bf16.gmra.mrb[24].mxu1 %v1623_v20 }
 0x327   :  { %1514 = vmatprep.mubr.bf16.mxu1 %v1624_v21 }
 0x32e   :  { %1515 = vmatmul.mubr.bf16.gmra.mrb[28].mxu1 %v1625_v22 }
 0x32f   :  { %1566 = vmatprep.mubr.bf16.mxu1 %v1634_v18 }
 0x3e9   :  { %v1504_v26 = vpop.f32.mrb[16].mxu1 }
 0x3ea   :  { %v782_v27 = vadd.f32 %v1504_v26, %v1268_v25  ;;  %v773_v28 = vpop.f32.mrb[17].mxu1 }
 0x3eb   :  { %v774_v29 = vadd.f32 %v1268_v25, %v773_v28  ;;  %v1505_v30 = vpop.f32.mrb[18].mxu1 }
 0x3ec   :  { %v785_v31 = vadd.f32 %v1505_v30, %v1268_v25  ;;  %v776_v32 = vpop.f32.mrb[19].mxu1  ;;  %v838_v34 = vmax.f32 %v782_v27, 0.0 }
 0x3ed   :  { %v777_v33 = vadd.f32 %v1268_v25, %v776_v32  ;;  %v836_v36 = vmax.f32 %v774_v29, 0.0 }
 0x3ee   :  { %v839_v35 = vmax.f32 %v785_v31, 0.0 }
 0x3ef   :  { %v837_v37 = vmax.f32 %v777_v33, 0.0 }
 0x3f0   :  { %v853_v38 = vpack.c.bf16 %v839_v35, %v838_v34 }
 0x3f1   :  { %v852_v39 = vpack.c.bf16 %v837_v37, %v836_v36  ;;  %v1508_v40 = vpop.f32.mrb[20].mxu1 }
 0x3f2   :  { %v798_v41 = vadd.f32 %v1508_v40, %v1268_v25  ;;  %v789_v42 = vpop.f32.mrb[21].mxu1 }
 0x3f3   :  { %v790_v43 = vadd.f32 %v1268_v25, %v789_v42  ;;  %v1509_v44 = vpop.f32.mrb[22].mxu1  ;;  %1534 = vmatprep.mubr.bf16.mxu0 %v852_v39 }
 0x3f4   :  { %v801_v45 = vadd.f32 %v1509_v44, %v1268_v25  ;;  %v792_v46 = vpop.f32.mrb[23].mxu1  ;;  %1535 = vmatmul.mubr.bf16.vlgmr.msra.gmra.mrb[32].mxu0 %v853_v38  ;;  %v842_v48 = vmax.f32 %v798_v41, 0.0  ;;  %v1636_v44 = vld [vmem:[%s1940_s0 + $0x10] sm:$0xff]  }
 0x3f5   :  { %v793_v47 = vadd.f32 %v1268_v25, %v792_v46  ;;  %v840_v50 = vmax.f32 %v790_v43, 0.0  ;;  %v1635_v43 = vld [vmem:[%s1940_s0 + $0x8] sm:$0xff]   ;;  %v1638_v46 = vld [vmem:[%s1940_s0 + $0x20] sm:$0xff]  }
 0x3f6   :  { %v843_v49 = vmax.f32 %v801_v45, 0.0  ;;  %v1637_v45 = vld [vmem:[%s1940_s0 + $0x18] sm:$0xff]  }
 0x3f7   :  { %v841_v51 = vmax.f32 %v793_v47, 0.0  ;;  %v1639_v47 = vld [vmem:[%s1940_s0 + $0x28] sm:$0xff]  }
 0x3f8   :  { %v855_v52 = vpack.c.bf16 %v843_v49, %v842_v48  ;;  %v1640_v48 = vld [vmem:[%s1940_s0 + $0x30] sm:$0xff]   ;;  %v1641_v49 = vld [vmem:[%s1940_s0 + $0x38] sm:$0xff]  }
 0x3f9   :  { %v854_v53 = vpack.c.bf16 %v841_v51, %v840_v50  ;;  %v1512_v54 = vpop.f32.mrb[24].mxu1  ;;  %v1285_v50 = vld [vmem:[%s1947_s7] ss:$0 sm:$0xff] }
 0x3fa   :  { %v814_v55 = vadd.f32 %v1512_v54, %v1268_v25  ;;  %v805_v56 = vpop.f32.mrb[25].mxu1 }
 0x3fb   :  { %v806_v57 = vadd.f32 %v1268_v25, %v805_v56  ;;  %v1513_v58 = vpop.f32.mrb[26].mxu1  ;;  %1538 = vmatprep.mubr.bf16.mxu0 %v854_v53 }
 0x3fc   :  { %v817_v59 = vadd.f32 %v1513_v58, %v1268_v25  ;;  %v808_v60 = vpop.f32.mrb[27].mxu1  ;;  %1539 = vmatmul.mubr.bf16.gmra.mrb[36].mxu0 %v855_v52  ;;  %v846_v62 = vmax.f32 %v814_v55, 0.0 }
 0x3fd   :  { %v809_v61 = vadd.f32 %v1268_v25, %v808_v60  ;;  %v844_v0 = vmax.f32 %v806_v57, 0.0 }
 0x3fe   :  { %v847_v63 = vmax.f32 %v817_v59, 0.0 }
 0x3ff   :  { %v845_v1 = vmax.f32 %v809_v61, 0.0 }
 0x400   :  { %v857_v2 = vpack.c.bf16 %v847_v63, %v846_v62 }
 0x401   :  { %v856_v3 = vpack.c.bf16 %v845_v1, %v844_v0  ;;  %v1516_v4 = vpop.f32.mrb[28].mxu1 }
 0x402   :  { %v830_v5 = vadd.f32 %v1516_v4, %v1268_v25  ;;  %v821_v6 = vpop.f32.mrb[29].mxu1 }
 0x403   :  { %v822_v7 = vadd.f32 %v1268_v25, %v821_v6  ;;  %v1517_v8 = vpop.f32.mrb[30].mxu1  ;;  %1542 = vmatprep.mubr.bf16.mxu0 %v856_v3 }
 0x404   :  { %v833_v9 = vadd.f32 %v1517_v8, %v1268_v25  ;;  %v824_v10 = vpop.f32.mrb[31].mxu1  ;;  %1543 = vmatmul.mubr.bf16.gmra.mrb[40].mxu0 %v857_v2  ;;  %v850_v12 = vmax.f32 %v830_v5, 0.0 }
 0x405   :  { %v825_v11 = vadd.f32 %v1268_v25, %v824_v10  ;;  %v848_v14 = vmax.f32 %v822_v7, 0.0 }
 0x406   :  { %v851_v13 = vmax.f32 %v833_v9, 0.0 }
 0x407   :  { %v849_v15 = vmax.f32 %v825_v11, 0.0 }
 0x408   :  { %v859_v16 = vpack.c.bf16 %v851_v13, %v850_v12 }
 0x409   :  { %v858_v17 = vpack.c.bf16 %v849_v15, %v848_v14 }
 0x40b   :  { %1546 = vmatprep.mubr.bf16.mxu0 %v858_v17 }
 0x40c   :  { %1547 = vmatmul.mubr.bf16.gmra.mrb[44].mxu0 %v859_v16 }
 0x4c7   :  { %v1536_v19 = vpop.f32.mrb[32].mxu0 }
 0x4c8   :  { %v974_v20 = vpop.f32.mrb[33].mxu0 }
 0x4c9   :  { %v1537_v21 = vpop.f32.mrb[34].mxu0 }
 0x4ca   :  { %v1054_v22 = vpack.c.bf16 %v1537_v21, %v1536_v19  ;;  %v977_v23 = vpop.f32.mrb[35].mxu0 }
 0x4cb   :  { %v1053_v24 = vpack.c.bf16 %v977_v23, %v974_v20 }
 0x4cd   :  { %1550 = vmatprep.subr.bf16.mxu1 %v1053_v24 }
 0x4ce   :  { %1551 = vmatpush3.bf16.msra.mxu1 %v1053_v24 }
 0x4cf   :  { %v1540_v25 = vpop.f32.mrb[36].mxu0  ;;  %1552 = vmatprep.subr.bf16.mxu1 %v1054_v22 }
 0x4d0   :  { %v990_v26 = vpop.f32.mrb[37].mxu0 }
 0x4d1   :  { %v1541_v27 = vpop.f32.mrb[38].mxu0 }
 0x4d2   :  { %v1056_v28 = vpack.c.bf16 %v1541_v27, %v1540_v25  ;;  %v993_v29 = vpop.f32.mrb[39].mxu0  ;;  %1553 = vmatpush3.bf16.msra.mxu1 %v1054_v22 }
 0x4d3   :  { %v1055_v30 = vpack.c.bf16 %v993_v29, %v990_v26 }
 0x4d5   :  { %1554 = vmatprep.subr.bf16.mxu1 %v1055_v30 }
 0x4d6   :  { %1555 = vmatpush3.bf16.msra.mxu1 %v1055_v30 }
 0x4d7   :  { %v1544_v31 = vpop.f32.mrb[40].mxu0  ;;  %1556 = vmatprep.subr.bf16.mxu1 %v1056_v28 }
 0x4d8   :  { %v1006_v32 = vpop.f32.mrb[41].mxu0 }
 0x4d9   :  { %v1545_v33 = vpop.f32.mrb[42].mxu0 }
 0x4da   :  { %v1058_v34 = vpack.c.bf16 %v1545_v33, %v1544_v31  ;;  %v1009_v35 = vpop.f32.mrb[43].mxu0  ;;  %1557 = vmatpush3.bf16.msra.mxu1 %v1056_v28 }
 0x4db   :  { %v1057_v36 = vpack.c.bf16 %v1009_v35, %v1006_v32 }
 0x4dd   :  { %1558 = vmatprep.subr.bf16.mxu1 %v1057_v36 }
 0x4de   :  { %1559 = vmatpush3.bf16.msra.mxu1 %v1057_v36 }
 0x4df   :  { %v1548_v37 = vpop.f32.mrb[44].mxu0  ;;  %1560 = vmatprep.subr.bf16.mxu1 %v1058_v34 }
 0x4e0   :  { %v1022_v38 = vpop.f32.mrb[45].mxu0 }
 0x4e1   :  { %v1549_v39 = vpop.f32.mrb[46].mxu0 }
 0x4e2   :  { %v1060_v40 = vpack.c.bf16 %v1549_v39, %v1548_v37  ;;  %v1025_v41 = vpop.f32.mrb[47].mxu0  ;;  %1561 = vmatpush3.bf16.msra.mxu1 %v1058_v34 }
 0x4e3   :  { %v1059_v42 = vpack.c.bf16 %v1025_v41, %v1022_v38 }
 0x4e5   :  { %1562 = vmatprep.subr.bf16.mxu1 %v1059_v42 }
 0x4e6   :  { %1563 = vmatpush3.bf16.msra.mxu1 %v1059_v42 }
 0x4e7   :  { %1564 = vmatprep.subr.bf16.mxu1 %v1060_v40 }
 0x4ea   :  { %1565 = vmatpush3.bf16.msra.mxu1 %v1060_v40 }
 0x4ed   :  { %1567 = vmatmul.mubr.bf16.vlgmr.msra.gmra.mrb[32].mxu1 %v1635_v43 }
 0x4ee   :  { %1570 = vmatprep.mubr.bf16.mxu1 %v1636_v44 }
 0x4f5   :  { %1571 = vmatmul.mubr.bf16.gmra.mrb[36].mxu1 %v1637_v45 }
 0x4f6   :  { %1574 = vmatprep.mubr.bf16.mxu1 %v1638_v46 }
 0x4fd   :  { %1575 = vmatmul.mubr.bf16.gmra.mrb[40].mxu1 %v1639_v47 }
 0x4fe   :  { %1578 = vmatprep.mubr.bf16.mxu1 %v1640_v48 }
 0x505   :  { %1579 = vmatmul.mubr.bf16.gmra.mrb[44].mxu1 %v1641_v49 }
 0x5c0   :  { %v1568_v51 = vpop.f32.mrb[32].mxu1 }
 0x5c1   :  { %v1159_v52 = vadd.f32 %v1568_v51, %v1285_v50  ;;  %v1150_v53 = vpop.f32.mrb[33].mxu1 }
 0x5c2   :  { %v1151_v54 = vadd.f32 %v1285_v50, %v1150_v53  ;;  %v1569_v55 = vpop.f32.mrb[34].mxu1 }
 0x5c3   :  { %1215 = vst [vmem:[%s1948_s8 + $0x10] sm:$0xff] %v1159_v52  ;;  %v1162_v56 = vadd.f32 %v1569_v55, %v1285_v50  ;;  %v1153_v57 = vpop.f32.mrb[35].mxu1 }
 0x5c4   :  { %1213 = vst [vmem:[%s1948_s8] sm:$0xff] %v1151_v54  ;;  %v1154_v58 = vadd.f32 %v1285_v50, %v1153_v57 }
 0x5c5   :  { %1216 = vst [vmem:[%s1948_s8 + $0x18] sm:$0xff] %v1162_v56 }
 0x5c6   :  { %1214 = vst [vmem:[%s1948_s8 + $0x8] sm:$0xff] %v1154_v58 }
 0x5c8   :  { %v1572_v59 = vpop.f32.mrb[36].mxu1 }
 0x5c9   :  { %v1175_v60 = vadd.f32 %v1572_v59, %v1285_v50  ;;  %v1166_v61 = vpop.f32.mrb[37].mxu1 }
 0x5ca   :  { %v1167_v62 = vadd.f32 %v1285_v50, %v1166_v61  ;;  %v1573_v63 = vpop.f32.mrb[38].mxu1 }
 0x5cb   :  { %1219 = vst [vmem:[%s1948_s8 + $0x30] sm:$0xff] %v1175_v60  ;;  %v1178_v0 = vadd.f32 %v1573_v63, %v1285_v50  ;;  %v1169_v1 = vpop.f32.mrb[39].mxu1 }
 0x5cc   :  { %1217 = vst [vmem:[%s1948_s8 + $0x20] sm:$0xff] %v1167_v62  ;;  %v1170_v2 = vadd.f32 %v1285_v50, %v1169_v1 }
 0x5cd   :  { %1220 = vst [vmem:[%s1948_s8 + $0x38] sm:$0xff] %v1178_v0 }
 0x5ce   :  { %1218 = vst [vmem:[%s1948_s8 + $0x28] sm:$0xff] %v1170_v2 }
 0x5d0   :  { %v1576_v3 = vpop.f32.mrb[40].mxu1 }
 0x5d1   :  { %v1191_v4 = vadd.f32 %v1576_v3, %v1285_v50  ;;  %v1182_v5 = vpop.f32.mrb[41].mxu1 }
 0x5d2   :  { %v1183_v6 = vadd.f32 %v1285_v50, %v1182_v5  ;;  %v1577_v7 = vpop.f32.mrb[42].mxu1 }
 0x5d3   :  { %1223 = vst [vmem:[%s1948_s8 + $0x50] sm:$0xff] %v1191_v4  ;;  %v1194_v8 = vadd.f32 %v1577_v7, %v1285_v50  ;;  %v1185_v9 = vpop.f32.mrb[43].mxu1 }
 0x5d4   :  { %1221 = vst [vmem:[%s1948_s8 + $0x40] sm:$0xff] %v1183_v6  ;;  %v1186_v10 = vadd.f32 %v1285_v50, %v1185_v9 }
 0x5d5   :  { %1224 = vst [vmem:[%s1948_s8 + $0x58] sm:$0xff] %v1194_v8 }
 0x5d6   :  { %1222 = vst [vmem:[%s1948_s8 + $0x48] sm:$0xff] %v1186_v10 }
 0x5d8   :  { %v1580_v11 = vpop.f32.mrb[44].mxu1 }
 0x5d9   :  { %v1207_v12 = vadd.f32 %v1580_v11, %v1285_v50  ;;  %v1198_v13 = vpop.f32.mrb[45].mxu1 }
 0x5da   :  { %v1199_v14 = vadd.f32 %v1285_v50, %v1198_v13  ;;  %v1581_v15 = vpop.f32.mrb[46].mxu1 }
 0x5db   :  { %1227 = vst [vmem:[%s1948_s8 + $0x70] sm:$0xff] %v1207_v12  ;;  %v1210_v16 = vadd.f32 %v1581_v15, %v1285_v50  ;;  %v1201_v17 = vpop.f32.mrb[47].mxu1 }
 0x5dc   :  { %1225 = vst [vmem:[%s1948_s8 + $0x60] sm:$0xff] %v1199_v14  ;;  %v1202_v18 = vadd.f32 %v1285_v50, %v1201_v17 }
 0x5dd   :  { %1228 = vst [vmem:[%s1948_s8 + $0x78] sm:$0xff] %v1210_v16 }
 0x5de   :  { %1226 = vst [vmem:[%s1948_s8 + $0x68] sm:$0xff] %v1202_v18 }
 0x5df   :  { %1233 = vsyncpa [#allocation4], 1 }
 0x5e0   :  { %1234 = vsyncpa [#allocation6], 1 }

</bundles_post_ra>
